<compile_context>
chip_gen: v5e
topology: v5e:2x2
jax: 0.10.0
libtpu: 0.0.40
codegen_flags: <defaults>
</compile_context>

<pallas_src>
from functools import partial

import jax
import jax.numpy as jnp
from jax.experimental import pallas as pl
from jax.experimental.pallas import tpu as pltpu

# ---------------------------------------------------------------------------
# Problem configuration (small, synthetic).
# ---------------------------------------------------------------------------
L = 3          # number of CNF layers in the chain
B = 8          # batch
D = 16         # data dimension
H = 32         # ODEnet hidden dimension
NSTEPS = 8     # fixed Euler steps per CNF layer (t in [0, 1])

# Row layout of the packed parameter buffers (all offsets 8-sublane aligned
# except the single trailing diag row, which is only read once per layer).
_ROW_W1T = 0                      # rows [0, D)          : W1^T            (D, H)
_ROW_W21 = D                      # rows [D, D+H)        : dt*W2^T@W1^T    (H, H)
_ROW_CB = D + H                   # rows [D+H, D+H+N*B)  : step biases     (N*B, H)
_ROW_DVEC = D + H + NSTEPS * B    # row  [D+H+N*B]       : dt*diag(W1@W2)  (1, H)
_HROWS = _ROW_DVEC + 1            # = 113
_ROW_W2T = 0                      # rows [0, H)          : dt*W2^T         (H, D)
_ROW_CSUM = H                     # rows [H, H+B)        : sum_n c2_dt[n]  (B, D)
_DROWS = H + B                    # = 40


# ---------------------------------------------------------------------------
# Kernel: the WHOLE chain (all layers x all Euler steps) in one invocation.
# ---------------------------------------------------------------------------
def _cnf_chain_kernel(hpack_ref, dpack_ref, x_ref, x_out_ref, logp_out_ref):
    x = x_ref[...]                                        # (B, D)
    # SequentialFlow: logpx = torch.zeros(x.shape[0], 1).to(x)
    logp = jnp.zeros(logp_out_ref.shape, jnp.float32)     # (B, 1)

    for l in range(L):               # short static trip counts -> full unroll
        w1t = hpack_ref[l, _ROW_W1T:_ROW_W1T + D, :]      # (D, H)
        w21 = hpack_ref[l, _ROW_W21:_ROW_W21 + H, :]      # (H, H)   dt*W2^T@W1^T
        dvec = hpack_ref[l, _ROW_DVEC:_ROW_DVEC + 1, :]   # (1, H)   dt*diag(W1@W2)
        w2t = dpack_ref[l, _ROW_W2T:_ROW_W2T + H, :]      # (H, D)   dt*W2^T
        csum = dpack_ref[l, _ROW_CSUM:_ROW_CSUM + B, :]   # (B, D)   sum_n c2_dt[n]

        # h-space recurrence: hx_n = x_n @ W1^T  (bias part lives in cb below).
        hx = jnp.dot(x, w1t, preferred_element_type=jnp.float32)   # (B, H)
        s = None                     # sum_n a_n
        qsq = None                   # sum_n a_n^2
        for n in range(NSTEPS):
            # Pre-broadcast (B,H) bias: b1 + t_n*u1 + sum_{m<n} c2_dt[m]@W1^T.
            cb = hpack_ref[l, _ROW_CB + n * B:_ROW_CB + (n + 1) * B, :]
            a = jnp.tanh(hx + cb)                                    # (B, H)
            s = a if s is None else s + a
            qsq = a * a if qsq is None else qsq + a * a
            if n + 1 < NSTEPS:       # last step's hx is never consumed
                hx = hx + jnp.dot(a, w21, preferred_element_type=jnp.float32)

        # Materialize x once per layer: x += (sum_n a_n) @ (dt*W2^T) + sum_n c2_dt[n].
        x = x + jnp.dot(s, w2t, preferred_element_type=jnp.float32) + csum
        # Deferred exact-trace divergence for the whole layer (off the x/hx chain):
        #   logp -= sum_n (1 - a_n^2) . (dt * diag(W1@W2))
        q = float(NSTEPS) - qsq                                      # (B, H)
        logp = logp - jnp.sum(q * dvec, axis=-1, keepdims=True)

    x_out_ref[...] = x
    logp_out_ref[...] = logp


def _run_chain(hpack, dpack, x):
    b, d = x.shape
    return pl.pallas_call(
        _cnf_chain_kernel,
        out_shape=(
            jax.ShapeDtypeStruct((b, d), jnp.float32),   # x state
            jax.ShapeDtypeStruct((b, 1), jnp.float32),   # logpx
        ),
        grid=(1,),   # single program: whole chain resident in VMEM (~50 KB)
        in_specs=[
            pl.BlockSpec(hpack.shape, lambda i: (0, 0, 0)),   # packed H-lane params
            pl.BlockSpec(dpack.shape, lambda i: (0, 0, 0)),   # packed D-lane params
            pl.BlockSpec((b, d), lambda i: (0, 0)),           # x
        ],
        out_specs=(
            pl.BlockSpec((b, d), lambda i: (0, 0)),
            pl.BlockSpec((b, 1), lambda i: (0, 0)),
        ),
        input_output_aliases={2: 0},     # x input buffer -> x output
        compiler_params=pltpu.CompilerParams(
            dimension_semantics=("arbitrary",)),
    )(hpack, dpack, x)


# ---------------------------------------------------------------------------
# Wrapper: bake layer order, time schedule, dt sign and all bias broadcasts
# into two packed arrays. Runs fused under the same jit as the pallas_call.
# ---------------------------------------------------------------------------
def _prepare(params, reverse):
    w1, b1, u1, w2, b2, u2 = params
    if reverse:
        w1, b1, u1, w2, b2, u2 = (a[::-1] for a in (w1, b1, u1, w2, b2, u2))
        t0, dt = 1.0, -1.0 / NSTEPS
    else:
        t0, dt = 0.0, 1.0 / NSTEPS
    t = t0 + dt * jnp.arange(NSTEPS, dtype=jnp.float32)                 # (N,)

    w1t = jnp.transpose(w1, (0, 2, 1))                                  # (L, D, H)
    w2t_dt = dt * jnp.transpose(w2, (0, 2, 1))                          # (L, H, D)
    w21 = jnp.einsum("lhd,ldk->lhk", w2t_dt, w1t)                       # (L, H, H)

    c1 = b1[:, None, :] + t[None, :, None] * u1[:, None, :]             # (L, N, H)
    c2_dt = dt * (b2[:, None, :] + t[None, :, None] * u2[:, None, :])   # (L, N, D)
    c2w1 = jnp.einsum("lnd,ldh->lnh", c2_dt, w1t)                       # (L, N, H)
    cum = jnp.cumsum(c2w1, axis=1) - c2w1                               # exclusive cumsum
    cb = c1 + cum                                                       # (L, N, H)
    cb_b = jnp.broadcast_to(cb[:, :, None, :],
                            (L, NSTEPS, B, H)).reshape(L, NSTEPS * B, H)
    csum = jnp.sum(c2_dt, axis=1)                                       # (L, D)
    csum_b = jnp.broadcast_to(csum[:, None, :], (L, B, D))              # (L, B, D)
    # Exact trace helper (lane-major row): dvec[l, k] = sum_j W1[l,k,j]*W2[l,j,k].
    dvec_dt = dt * jnp.einsum("lkj,ljk->lk", w1, w2)                    # (L, H)

    hpack = jnp.concatenate([w1t, w21, cb_b, dvec_dt[:, None, :]], axis=1)  # (L,113,H)
    dpack = jnp.concatenate([w2t_dt, csum_b], axis=1)                       # (L, 40,D)
    return hpack, dpack


@partial(jax.jit, static_argnames=("reverse",))
def sequential_flow(x, params, reverse=False):
    """Pallas implementation of SequentialFlow.forward. Returns (x, -logpx)."""
    hpack, dpack = _prepare(params, reverse)
    x_out, logpx = _run_chain(hpack, dpack, x)
    return x_out, -logpx


# ---------------------------------------------------------------------------
# Deterministic parameter construction + pure-JAX reference for validation.
# ---------------------------------------------------------------------------
def make_params(key):
    keys = jax.random.split(key, 6)
    w1 = 0.3 * jax.random.normal(keys[0], (L, H, D), jnp.float32) / jnp.sqrt(D)
    b1 = 0.1 * jax.random.normal(keys[1], (L, H), jnp.float32)
    u1 = 0.1 * jax.random.normal(keys[2], (L, H), jnp.float32)
    w2 = 0.3 * jax.random.normal(keys[3], (L, D, H), jnp.float32) / jnp.sqrt(H)
    b2 = 0.1 * jax.random.normal(keys[4], (L, D), jnp.float32)
    u2 = 0.1 * jax.random.normal(keys[5], (L, D), jnp.float32)
    return (w1, b1, u1, w2, b2, u2)


def _reference(x, params, reverse=False):
    """Pure-JAX reference of the same synthetic CNF chain."""
    w1, b1, u1, w2, b2, u2 = params
    num_layers = w1.shape[0]
    inds = range(num_layers - 1, -1, -1) if reverse else range(num_layers)
    t0, dt = (1.0, -1.0 / NSTEPS) if reverse else (0.0, 1.0 / NSTEPS)
    logp = jnp.zeros((x.shape[0], 1), jnp.float32)
    for i in inds:
        dvec = jnp.sum(w1[i] * w2[i].T, axis=-1)            # diag(W1 @ W2), (H,)
        for n in range(NSTEPS):
            t = t0 + n * dt
            a = jnp.tanh(x @ w1[i].T + b1[i] + t * u1[i])
            f = a @ w2[i].T + b2[i] + t * u2[i]
            div = jnp.sum((1.0 - a * a) * dvec, axis=-1, keepdims=True)
            x = x + dt * f
            logp = logp - dt * div
    return x, -logp


if __name__ == "__main__":
    key = jax.random.PRNGKey(0)
    kx, kp = jax.random.split(key)
    x = jax.random.normal(kx, (B, D), jnp.float32)
    params = make_params(kp)

    # Forward direction of the chain (z -> x in FFJORD convention).
    z, neg_logpx = sequential_flow(x, params, reverse=False)
    jax.block_until_ready((z, neg_logpx))
    assert z.shape == (B, D) and neg_logpx.shape == (B, 1)
    assert jnp.all(jnp.isfinite(z)) and jnp.all(jnp.isfinite(neg_logpx))

    z_ref, nl_ref = _reference(x, params, reverse=False)
    assert jnp.allclose(z, z_ref, atol=2e-2, rtol=2e-2)
    assert jnp.allclose(neg_logpx, nl_ref, atol=2e-2, rtol=2e-2)

    # Reverse (x -> z) direction: time-reversed Euler integration, same kernel.
    # TODO(synk): reverse is the time-reversed solve (as in the reference), not
    # the exact algebraic inverse of the forward Euler map.
    xr, neg_logpr = sequential_flow(z, params, reverse=True)
    jax.block_until_ready((xr, neg_logpr))
    assert jnp.all(jnp.isfinite(xr)) and jnp.all(jnp.isfinite(neg_logpr))

    xr_ref, nlr_ref = _reference(z, params, reverse=True)
    assert jnp.allclose(xr, xr_ref, atol=2e-2, rtol=2e-2)
    assert jnp.allclose(neg_logpr, nlr_ref, atol=2e-2, rtol=2e-2)

    print("KERNEL_OK")
</pallas_src>

<mosaic_0001>
module attributes {stable_mosaic.version = 11 : i64} {
  func.func @_cnf_chain_kernel(%arg0: i32, %arg1: memref<3x113x32xf32, #tpu.memory_space<vmem>>, %arg2: memref<3x40x16xf32, #tpu.memory_space<vmem>>, %arg3: memref<8x16xf32, #tpu.memory_space<vmem>>, %arg4: memref<8x16xf32, #tpu.memory_space<vmem>>, %arg5: memref<8x1xf32, #tpu.memory_space<vmem>>) attributes {dimension_semantics = [#tpu.dimension_semantics<arbitrary>], iteration_bounds = array<i64: 1>, scalar_prefetch = 0 : i64, scratch_operands = 0 : i64, tpu.core_type = #tpu.core_type<tc>, window_params = [{pipeline_mode = #tpu.pipeline_mode<synchronous>, transform_indices = @transform_0, window_bounds = array<i64: 3, 113, 32>}, {pipeline_mode = #tpu.pipeline_mode<synchronous>, transform_indices = @transform_1, window_bounds = array<i64: 3, 40, 16>}, {pipeline_mode = #tpu.pipeline_mode<synchronous>, transform_indices = @transform_2, window_bounds = array<i64: 8, 16>}, {pipeline_mode = #tpu.pipeline_mode<synchronous>, transform_indices = @transform_3, window_bounds = array<i64: 8, 16>}, {pipeline_mode = #tpu.pipeline_mode<synchronous>, transform_indices = @transform_4, window_bounds = array<i64: 8, 1>}]} {
    %c0 = arith.constant 0 : index
    %c0_0 = arith.constant 0 : index
    %0 = vector.load %arg3[%c0, %c0_0] : memref<8x16xf32, #tpu.memory_space<vmem>>, vector<8x16xf32>
    %cst = arith.constant 0.000000e+00 : f32
    %1 = vector.broadcast %cst : f32 to vector<8x1xf32>
    %c0_1 = arith.constant 0 : index
    %c0_2 = arith.constant 0 : index
    %c0_3 = arith.constant 0 : index
    %2 = vector.load %arg1[%c0_1, %c0_2, %c0_3] : memref<3x113x32xf32, #tpu.memory_space<vmem>>, vector<1x16x32xf32>
    %3 = vector.shape_cast %2 : vector<1x16x32xf32> to vector<16x32xf32>
    %c0_4 = arith.constant 0 : index
    %c16 = arith.constant 16 : index
    %c0_5 = arith.constant 0 : index
    %4 = vector.load %arg1[%c0_4, %c16, %c0_5] : memref<3x113x32xf32, #tpu.memory_space<vmem>>, vector<1x32x32xf32>
    %5 = vector.shape_cast %4 : vector<1x32x32xf32> to vector<32x32xf32>
    %c0_6 = arith.constant 0 : index
    %c112 = arith.constant 112 : index
    %c0_7 = arith.constant 0 : index
    %6 = vector.load %arg1[%c0_6, %c112, %c0_7] : memref<3x113x32xf32, #tpu.memory_space<vmem>>, vector<1x1x32xf32>
    %7 = vector.shape_cast %6 : vector<1x1x32xf32> to vector<1x32xf32>
    %c0_8 = arith.constant 0 : index
    %c0_9 = arith.constant 0 : index
    %c0_10 = arith.constant 0 : index
    %8 = vector.load %arg2[%c0_8, %c0_9, %c0_10] : memref<3x40x16xf32, #tpu.memory_space<vmem>>, vector<1x32x16xf32>
    %9 = vector.shape_cast %8 : vector<1x32x16xf32> to vector<32x16xf32>
    %c0_11 = arith.constant 0 : index
    %c32 = arith.constant 32 : index
    %c0_12 = arith.constant 0 : index
    %10 = vector.load %arg2[%c0_11, %c32, %c0_12] : memref<3x40x16xf32, #tpu.memory_space<vmem>>, vector<1x8x16xf32>
    %11 = vector.shape_cast %10 : vector<1x8x16xf32> to vector<8x16xf32>
    %cst_13 = arith.constant dense<0.000000e+00> : vector<8x32xf32>
    %12 = tpu.matmul %0, %3, %cst_13 {dimension_numbers = #tpu.dot_dimension_numbers<[1], [0], [0], [1], [0, 0, 1, 1], [], []>} : vector<8x16xf32>, vector<16x32xf32>, vector<8x32xf32> -> vector<8x32xf32>
    %c0_14 = arith.constant 0 : index
    %c48 = arith.constant 48 : index
    %c0_15 = arith.constant 0 : index
    %13 = vector.load %arg1[%c0_14, %c48, %c0_15] : memref<3x113x32xf32, #tpu.memory_space<vmem>>, vector<1x8x32xf32>
    %14 = vector.shape_cast %13 : vector<1x8x32xf32> to vector<8x32xf32>
    %15 = arith.addf %12, %14 : vector<8x32xf32>
    %16 = math.tanh %15 : vector<8x32xf32>
    %17 = arith.mulf %16, %16 : vector<8x32xf32>
    %cst_16 = arith.constant dense<0.000000e+00> : vector<8x32xf32>
    %18 = tpu.matmul %16, %5, %cst_16 {dimension_numbers = #tpu.dot_dimension_numbers<[1], [0], [0], [1], [0, 0, 1, 1], [], []>} : vector<8x32xf32>, vector<32x32xf32>, vector<8x32xf32> -> vector<8x32xf32>
    %19 = arith.addf %12, %18 : vector<8x32xf32>
    %c0_17 = arith.constant 0 : index
    %c56 = arith.constant 56 : index
    %c0_18 = arith.constant 0 : index
    %20 = vector.load %arg1[%c0_17, %c56, %c0_18] : memref<3x113x32xf32, #tpu.memory_space<vmem>>, vector<1x8x32xf32>
    %21 = vector.shape_cast %20 : vector<1x8x32xf32> to vector<8x32xf32>
    %22 = arith.addf %19, %21 : vector<8x32xf32>
    %23 = math.tanh %22 : vector<8x32xf32>
    %24 = arith.addf %16, %23 : vector<8x32xf32>
    %25 = arith.mulf %23, %23 : vector<8x32xf32>
    %26 = arith.addf %17, %25 : vector<8x32xf32>
    %cst_19 = arith.constant dense<0.000000e+00> : vector<8x32xf32>
    %27 = tpu.matmul %23, %5, %cst_19 {dimension_numbers = #tpu.dot_dimension_numbers<[1], [0], [0], [1], [0, 0, 1, 1], [], []>} : vector<8x32xf32>, vector<32x32xf32>, vector<8x32xf32> -> vector<8x32xf32>
    %28 = arith.addf %19, %27 : vector<8x32xf32>
    %c0_20 = arith.constant 0 : index
    %c64 = arith.constant 64 : index
    %c0_21 = arith.constant 0 : index
    %29 = vector.load %arg1[%c0_20, %c64, %c0_21] : memref<3x113x32xf32, #tpu.memory_space<vmem>>, vector<1x8x32xf32>
    %30 = vector.shape_cast %29 : vector<1x8x32xf32> to vector<8x32xf32>
    %31 = arith.addf %28, %30 : vector<8x32xf32>
    %32 = math.tanh %31 : vector<8x32xf32>
    %33 = arith.addf %24, %32 : vector<8x32xf32>
    %34 = arith.mulf %32, %32 : vector<8x32xf32>
    %35 = arith.addf %26, %34 : vector<8x32xf32>
    %cst_22 = arith.constant dense<0.000000e+00> : vector<8x32xf32>
    %36 = tpu.matmul %32, %5, %cst_22 {dimension_numbers = #tpu.dot_dimension_numbers<[1], [0], [0], [1], [0, 0, 1, 1], [], []>} : vector<8x32xf32>, vector<32x32xf32>, vector<8x32xf32> -> vector<8x32xf32>
    %37 = arith.addf %28, %36 : vector<8x32xf32>
    %c0_23 = arith.constant 0 : index
    %c72 = arith.constant 72 : index
    %c0_24 = arith.constant 0 : index
    %38 = vector.load %arg1[%c0_23, %c72, %c0_24] : memref<3x113x32xf32, #tpu.memory_space<vmem>>, vector<1x8x32xf32>
    %39 = vector.shape_cast %38 : vector<1x8x32xf32> to vector<8x32xf32>
    %40 = arith.addf %37, %39 : vector<8x32xf32>
    %41 = math.tanh %40 : vector<8x32xf32>
    %42 = arith.addf %33, %41 : vector<8x32xf32>
    %43 = arith.mulf %41, %41 : vector<8x32xf32>
    %44 = arith.addf %35, %43 : vector<8x32xf32>
    %cst_25 = arith.constant dense<0.000000e+00> : vector<8x32xf32>
    %45 = tpu.matmul %41, %5, %cst_25 {dimension_numbers = #tpu.dot_dimension_numbers<[1], [0], [0], [1], [0, 0, 1, 1], [], []>} : vector<8x32xf32>, vector<32x32xf32>, vector<8x32xf32> -> vector<8x32xf32>
    %46 = arith.addf %37, %45 : vector<8x32xf32>
    %c0_26 = arith.constant 0 : index
    %c80 = arith.constant 80 : index
    %c0_27 = arith.constant 0 : index
    %47 = vector.load %arg1[%c0_26, %c80, %c0_27] : memref<3x113x32xf32, #tpu.memory_space<vmem>>, vector<1x8x32xf32>
    %48 = vector.shape_cast %47 : vector<1x8x32xf32> to vector<8x32xf32>
    %49 = arith.addf %46, %48 : vector<8x32xf32>
    %50 = math.tanh %49 : vector<8x32xf32>
    %51 = arith.addf %42, %50 : vector<8x32xf32>
    %52 = arith.mulf %50, %50 : vector<8x32xf32>
    %53 = arith.addf %44, %52 : vector<8x32xf32>
    %cst_28 = arith.constant dense<0.000000e+00> : vector<8x32xf32>
    %54 = tpu.matmul %50, %5, %cst_28 {dimension_numbers = #tpu.dot_dimension_numbers<[1], [0], [0], [1], [0, 0, 1, 1], [], []>} : vector<8x32xf32>, vector<32x32xf32>, vector<8x32xf32> -> vector<8x32xf32>
    %55 = arith.addf %46, %54 : vector<8x32xf32>
    %c0_29 = arith.constant 0 : index
    %c88 = arith.constant 88 : index
    %c0_30 = arith.constant 0 : index
    %56 = vector.load %arg1[%c0_29, %c88, %c0_30] : memref<3x113x32xf32, #tpu.memory_space<vmem>>, vector<1x8x32xf32>
    %57 = vector.shape_cast %56 : vector<1x8x32xf32> to vector<8x32xf32>
    %58 = arith.addf %55, %57 : vector<8x32xf32>
    %59 = math.tanh %58 : vector<8x32xf32>
    %60 = arith.addf %51, %59 : vector<8x32xf32>
    %61 = arith.mulf %59, %59 : vector<8x32xf32>
    %62 = arith.addf %53, %61 : vector<8x32xf32>
    %cst_31 = arith.constant dense<0.000000e+00> : vector<8x32xf32>
    %63 = tpu.matmul %59, %5, %cst_31 {dimension_numbers = #tpu.dot_dimension_numbers<[1], [0], [0], [1], [0, 0, 1, 1], [], []>} : vector<8x32xf32>, vector<32x32xf32>, vector<8x32xf32> -> vector<8x32xf32>
    %64 = arith.addf %55, %63 : vector<8x32xf32>
    %c0_32 = arith.constant 0 : index
    %c96 = arith.constant 96 : index
    %c0_33 = arith.constant 0 : index
    %65 = vector.load %arg1[%c0_32, %c96, %c0_33] : memref<3x113x32xf32, #tpu.memory_space<vmem>>, vector<1x8x32xf32>
    %66 = vector.shape_cast %65 : vector<1x8x32xf32> to vector<8x32xf32>
    %67 = arith.addf %64, %66 : vector<8x32xf32>
    %68 = math.tanh %67 : vector<8x32xf32>
    %69 = arith.addf %60, %68 : vector<8x32xf32>
    %70 = arith.mulf %68, %68 : vector<8x32xf32>
    %71 = arith.addf %62, %70 : vector<8x32xf32>
    %cst_34 = arith.constant dense<0.000000e+00> : vector<8x32xf32>
    %72 = tpu.matmul %68, %5, %cst_34 {dimension_numbers = #tpu.dot_dimension_numbers<[1], [0], [0], [1], [0, 0, 1, 1], [], []>} : vector<8x32xf32>, vector<32x32xf32>, vector<8x32xf32> -> vector<8x32xf32>
    %73 = arith.addf %64, %72 : vector<8x32xf32>
    %c0_35 = arith.constant 0 : index
    %c104 = arith.constant 104 : index
    %c0_36 = arith.constant 0 : index
    %74 = vector.load %arg1[%c0_35, %c104, %c0_36] : memref<3x113x32xf32, #tpu.memory_space<vmem>>, vector<1x8x32xf32>
    %75 = vector.shape_cast %74 : vector<1x8x32xf32> to vector<8x32xf32>
    %76 = arith.addf %73, %75 : vector<8x32xf32>
    %77 = math.tanh %76 : vector<8x32xf32>
    %78 = arith.addf %69, %77 : vector<8x32xf32>
    %79 = arith.mulf %77, %77 : vector<8x32xf32>
    %80 = arith.addf %71, %79 : vector<8x32xf32>
    %cst_37 = arith.constant dense<0.000000e+00> : vector<8x16xf32>
    %81 = tpu.matmul %78, %9, %cst_37 {dimension_numbers = #tpu.dot_dimension_numbers<[1], [0], [0], [1], [0, 0, 1, 1], [], []>} : vector<8x32xf32>, vector<32x16xf32>, vector<8x16xf32> -> vector<8x16xf32>
    %82 = arith.addf %0, %81 : vector<8x16xf32>
    %83 = arith.addf %82, %11 : vector<8x16xf32>
    %cst_38 = arith.constant 8.000000e+00 : f32
    %84 = vector.broadcast %cst_38 : f32 to vector<8x32xf32>
    %85 = arith.subf %84, %80 : vector<8x32xf32>
    %86 = vector.broadcast %7 : vector<1x32xf32> to vector<8x32xf32>
    %87 = arith.mulf %85, %86 : vector<8x32xf32>
    %cst_39 = arith.constant dense<0.000000e+00> : vector<8xf32>
    %88 = vector.multi_reduction <add>, %87, %cst_39 [1] : vector<8x32xf32> to vector<8xf32>
    %89 = vector.shape_cast %88 : vector<8xf32> to vector<8x1xf32>
    %90 = arith.subf %1, %89 : vector<8x1xf32>
    %c1 = arith.constant 1 : index
    %c0_40 = arith.constant 0 : index
    %c0_41 = arith.constant 0 : index
    %91 = vector.load %arg1[%c1, %c0_40, %c0_41] : memref<3x113x32xf32, #tpu.memory_space<vmem>>, vector<1x16x32xf32>
    %92 = vector.shape_cast %91 : vector<1x16x32xf32> to vector<16x32xf32>
    %c1_42 = arith.constant 1 : index
    %c16_43 = arith.constant 16 : index
    %c0_44 = arith.constant 0 : index
    %93 = vector.load %arg1[%c1_42, %c16_43, %c0_44] : memref<3x113x32xf32, #tpu.memory_space<vmem>>, vector<1x32x32xf32>
    %94 = vector.shape_cast %93 : vector<1x32x32xf32> to vector<32x32xf32>
    %c1_45 = arith.constant 1 : index
    %c112_46 = arith.constant 112 : index
    %c0_47 = arith.constant 0 : index
    %95 = vector.load %arg1[%c1_45, %c112_46, %c0_47] : memref<3x113x32xf32, #tpu.memory_space<vmem>>, vector<1x1x32xf32>
    %96 = vector.shape_cast %95 : vector<1x1x32xf32> to vector<1x32xf32>
    %c1_48 = arith.constant 1 : index
    %c0_49 = arith.constant 0 : index
    %c0_50 = arith.constant 0 : index
    %97 = vector.load %arg2[%c1_48, %c0_49, %c0_50] : memref<3x40x16xf32, #tpu.memory_space<vmem>>, vector<1x32x16xf32>
    %98 = vector.shape_cast %97 : vector<1x32x16xf32> to vector<32x16xf32>
    %c1_51 = arith.constant 1 : index
    %c32_52 = arith.constant 32 : index
    %c0_53 = arith.constant 0 : index
    %99 = vector.load %arg2[%c1_51, %c32_52, %c0_53] : memref<3x40x16xf32, #tpu.memory_space<vmem>>, vector<1x8x16xf32>
    %100 = vector.shape_cast %99 : vector<1x8x16xf32> to vector<8x16xf32>
    %cst_54 = arith.constant dense<0.000000e+00> : vector<8x32xf32>
    %101 = tpu.matmul %83, %92, %cst_54 {dimension_numbers = #tpu.dot_dimension_numbers<[1], [0], [0], [1], [0, 0, 1, 1], [], []>} : vector<8x16xf32>, vector<16x32xf32>, vector<8x32xf32> -> vector<8x32xf32>
    %c1_55 = arith.constant 1 : index
    %c48_56 = arith.constant 48 : index
    %c0_57 = arith.constant 0 : index
    %102 = vector.load %arg1[%c1_55, %c48_56, %c0_57] : memref<3x113x32xf32, #tpu.memory_space<vmem>>, vector<1x8x32xf32>
    %103 = vector.shape_cast %102 : vector<1x8x32xf32> to vector<8x32xf32>
    %104 = arith.addf %101, %103 : vector<8x32xf32>
    %105 = math.tanh %104 : vector<8x32xf32>
    %106 = arith.mulf %105, %105 : vector<8x32xf32>
    %cst_58 = arith.constant dense<0.000000e+00> : vector<8x32xf32>
    %107 = tpu.matmul %105, %94, %cst_58 {dimension_numbers = #tpu.dot_dimension_numbers<[1], [0], [0], [1], [0, 0, 1, 1], [], []>} : vector<8x32xf32>, vector<32x32xf32>, vector<8x32xf32> -> vector<8x32xf32>
    %108 = arith.addf %101, %107 : vector<8x32xf32>
    %c1_59 = arith.constant 1 : index
    %c56_60 = arith.constant 56 : index
    %c0_61 = arith.constant 0 : index
    %109 = vector.load %arg1[%c1_59, %c56_60, %c0_61] : memref<3x113x32xf32, #tpu.memory_space<vmem>>, vector<1x8x32xf32>
    %110 = vector.shape_cast %109 : vector<1x8x32xf32> to vector<8x32xf32>
    %111 = arith.addf %108, %110 : vector<8x32xf32>
    %112 = math.tanh %111 : vector<8x32xf32>
    %113 = arith.addf %105, %112 : vector<8x32xf32>
    %114 = arith.mulf %112, %112 : vector<8x32xf32>
    %115 = arith.addf %106, %114 : vector<8x32xf32>
    %cst_62 = arith.constant dense<0.000000e+00> : vector<8x32xf32>
    %116 = tpu.matmul %112, %94, %cst_62 {dimension_numbers = #tpu.dot_dimension_numbers<[1], [0], [0], [1], [0, 0, 1, 1], [], []>} : vector<8x32xf32>, vector<32x32xf32>, vector<8x32xf32> -> vector<8x32xf32>
    %117 = arith.addf %108, %116 : vector<8x32xf32>
    %c1_63 = arith.constant 1 : index
    %c64_64 = arith.constant 64 : index
    %c0_65 = arith.constant 0 : index
    %118 = vector.load %arg1[%c1_63, %c64_64, %c0_65] : memref<3x113x32xf32, #tpu.memory_space<vmem>>, vector<1x8x32xf32>
    %119 = vector.shape_cast %118 : vector<1x8x32xf32> to vector<8x32xf32>
    %120 = arith.addf %117, %119 : vector<8x32xf32>
    %121 = math.tanh %120 : vector<8x32xf32>
    %122 = arith.addf %113, %121 : vector<8x32xf32>
    %123 = arith.mulf %121, %121 : vector<8x32xf32>
    %124 = arith.addf %115, %123 : vector<8x32xf32>
    %cst_66 = arith.constant dense<0.000000e+00> : vector<8x32xf32>
    %125 = tpu.matmul %121, %94, %cst_66 {dimension_numbers = #tpu.dot_dimension_numbers<[1], [0], [0], [1], [0, 0, 1, 1], [], []>} : vector<8x32xf32>, vector<32x32xf32>, vector<8x32xf32> -> vector<8x32xf32>
    %126 = arith.addf %117, %125 : vector<8x32xf32>
    %c1_67 = arith.constant 1 : index
    %c72_68 = arith.constant 72 : index
    %c0_69 = arith.constant 0 : index
    %127 = vector.load %arg1[%c1_67, %c72_68, %c0_69] : memref<3x113x32xf32, #tpu.memory_space<vmem>>, vector<1x8x32xf32>
    %128 = vector.shape_cast %127 : vector<1x8x32xf32> to vector<8x32xf32>
    %129 = arith.addf %126, %128 : vector<8x32xf32>
    %130 = math.tanh %129 : vector<8x32xf32>
    %131 = arith.addf %122, %130 : vector<8x32xf32>
    %132 = arith.mulf %130, %130 : vector<8x32xf32>
    %133 = arith.addf %124, %132 : vector<8x32xf32>
    %cst_70 = arith.constant dense<0.000000e+00> : vector<8x32xf32>
    %134 = tpu.matmul %130, %94, %cst_70 {dimension_numbers = #tpu.dot_dimension_numbers<[1], [0], [0], [1], [0, 0, 1, 1], [], []>} : vector<8x32xf32>, vector<32x32xf32>, vector<8x32xf32> -> vector<8x32xf32>
    %135 = arith.addf %126, %134 : vector<8x32xf32>
    %c1_71 = arith.constant 1 : index
    %c80_72 = arith.constant 80 : index
    %c0_73 = arith.constant 0 : index
    %136 = vector.load %arg1[%c1_71, %c80_72, %c0_73] : memref<3x113x32xf32, #tpu.memory_space<vmem>>, vector<1x8x32xf32>
    %137 = vector.shape_cast %136 : vector<1x8x32xf32> to vector<8x32xf32>
    %138 = arith.addf %135, %137 : vector<8x32xf32>
    %139 = math.tanh %138 : vector<8x32xf32>
    %140 = arith.addf %131, %139 : vector<8x32xf32>
    %141 = arith.mulf %139, %139 : vector<8x32xf32>
    %142 = arith.addf %133, %141 : vector<8x32xf32>
    %cst_74 = arith.constant dense<0.000000e+00> : vector<8x32xf32>
    %143 = tpu.matmul %139, %94, %cst_74 {dimension_numbers = #tpu.dot_dimension_numbers<[1], [0], [0], [1], [0, 0, 1, 1], [], []>} : vector<8x32xf32>, vector<32x32xf32>, vector<8x32xf32> -> vector<8x32xf32>
    %144 = arith.addf %135, %143 : vector<8x32xf32>
    %c1_75 = arith.constant 1 : index
    %c88_76 = arith.constant 88 : index
    %c0_77 = arith.constant 0 : index
    %145 = vector.load %arg1[%c1_75, %c88_76, %c0_77] : memref<3x113x32xf32, #tpu.memory_space<vmem>>, vector<1x8x32xf32>
    %146 = vector.shape_cast %145 : vector<1x8x32xf32> to vector<8x32xf32>
    %147 = arith.addf %144, %146 : vector<8x32xf32>
    %148 = math.tanh %147 : vector<8x32xf32>
    %149 = arith.addf %140, %148 : vector<8x32xf32>
    %150 = arith.mulf %148, %148 : vector<8x32xf32>
    %151 = arith.addf %142, %150 : vector<8x32xf32>
    %cst_78 = arith.constant dense<0.000000e+00> : vector<8x32xf32>
    %152 = tpu.matmul %148, %94, %cst_78 {dimension_numbers = #tpu.dot_dimension_numbers<[1], [0], [0], [1], [0, 0, 1, 1], [], []>} : vector<8x32xf32>, vector<32x32xf32>, vector<8x32xf32> -> vector<8x32xf32>
    %153 = arith.addf %144, %152 : vector<8x32xf32>
    %c1_79 = arith.constant 1 : index
    %c96_80 = arith.constant 96 : index
    %c0_81 = arith.constant 0 : index
    %154 = vector.load %arg1[%c1_79, %c96_80, %c0_81] : memref<3x113x32xf32, #tpu.memory_space<vmem>>, vector<1x8x32xf32>
    %155 = vector.shape_cast %154 : vector<1x8x32xf32> to vector<8x32xf32>
    %156 = arith.addf %153, %155 : vector<8x32xf32>
    %157 = math.tanh %156 : vector<8x32xf32>
    %158 = arith.addf %149, %157 : vector<8x32xf32>
    %159 = arith.mulf %157, %157 : vector<8x32xf32>
    %160 = arith.addf %151, %159 : vector<8x32xf32>
    %cst_82 = arith.constant dense<0.000000e+00> : vector<8x32xf32>
    %161 = tpu.matmul %157, %94, %cst_82 {dimension_numbers = #tpu.dot_dimension_numbers<[1], [0], [0], [1], [0, 0, 1, 1], [], []>} : vector<8x32xf32>, vector<32x32xf32>, vector<8x32xf32> -> vector<8x32xf32>
    %162 = arith.addf %153, %161 : vector<8x32xf32>
    %c1_83 = arith.constant 1 : index
    %c104_84 = arith.constant 104 : index
    %c0_85 = arith.constant 0 : index
    %163 = vector.load %arg1[%c1_83, %c104_84, %c0_85] : memref<3x113x32xf32, #tpu.memory_space<vmem>>, vector<1x8x32xf32>
    %164 = vector.shape_cast %163 : vector<1x8x32xf32> to vector<8x32xf32>
    %165 = arith.addf %162, %164 : vector<8x32xf32>
    %166 = math.tanh %165 : vector<8x32xf32>
    %167 = arith.addf %158, %166 : vector<8x32xf32>
    %168 = arith.mulf %166, %166 : vector<8x32xf32>
    %169 = arith.addf %160, %168 : vector<8x32xf32>
    %cst_86 = arith.constant dense<0.000000e+00> : vector<8x16xf32>
    %170 = tpu.matmul %167, %98, %cst_86 {dimension_numbers = #tpu.dot_dimension_numbers<[1], [0], [0], [1], [0, 0, 1, 1], [], []>} : vector<8x32xf32>, vector<32x16xf32>, vector<8x16xf32> -> vector<8x16xf32>
    %171 = arith.addf %83, %170 : vector<8x16xf32>
    %172 = arith.addf %171, %100 : vector<8x16xf32>
    %cst_87 = arith.constant 8.000000e+00 : f32
    %173 = vector.broadcast %cst_87 : f32 to vector<8x32xf32>
    %174 = arith.subf %173, %169 : vector<8x32xf32>
    %175 = vector.broadcast %96 : vector<1x32xf32> to vector<8x32xf32>
    %176 = arith.mulf %174, %175 : vector<8x32xf32>
    %cst_88 = arith.constant dense<0.000000e+00> : vector<8xf32>
    %177 = vector.multi_reduction <add>, %176, %cst_88 [1] : vector<8x32xf32> to vector<8xf32>
    %178 = vector.shape_cast %177 : vector<8xf32> to vector<8x1xf32>
    %179 = arith.subf %90, %178 : vector<8x1xf32>
    %c2 = arith.constant 2 : index
    %c0_89 = arith.constant 0 : index
    %c0_90 = arith.constant 0 : index
    %180 = vector.load %arg1[%c2, %c0_89, %c0_90] : memref<3x113x32xf32, #tpu.memory_space<vmem>>, vector<1x16x32xf32>
    %181 = vector.shape_cast %180 : vector<1x16x32xf32> to vector<16x32xf32>
    %c2_91 = arith.constant 2 : index
    %c16_92 = arith.constant 16 : index
    %c0_93 = arith.constant 0 : index
    %182 = vector.load %arg1[%c2_91, %c16_92, %c0_93] : memref<3x113x32xf32, #tpu.memory_space<vmem>>, vector<1x32x32xf32>
    %183 = vector.shape_cast %182 : vector<1x32x32xf32> to vector<32x32xf32>
    %c2_94 = arith.constant 2 : index
    %c112_95 = arith.constant 112 : index
    %c0_96 = arith.constant 0 : index
    %184 = vector.load %arg1[%c2_94, %c112_95, %c0_96] : memref<3x113x32xf32, #tpu.memory_space<vmem>>, vector<1x1x32xf32>
    %185 = vector.shape_cast %184 : vector<1x1x32xf32> to vector<1x32xf32>
    %c2_97 = arith.constant 2 : index
    %c0_98 = arith.constant 0 : index
    %c0_99 = arith.constant 0 : index
    %186 = vector.load %arg2[%c2_97, %c0_98, %c0_99] : memref<3x40x16xf32, #tpu.memory_space<vmem>>, vector<1x32x16xf32>
    %187 = vector.shape_cast %186 : vector<1x32x16xf32> to vector<32x16xf32>
    %c2_100 = arith.constant 2 : index
    %c32_101 = arith.constant 32 : index
    %c0_102 = arith.constant 0 : index
    %188 = vector.load %arg2[%c2_100, %c32_101, %c0_102] : memref<3x40x16xf32, #tpu.memory_space<vmem>>, vector<1x8x16xf32>
    %189 = vector.shape_cast %188 : vector<1x8x16xf32> to vector<8x16xf32>
    %cst_103 = arith.constant dense<0.000000e+00> : vector<8x32xf32>
    %190 = tpu.matmul %172, %181, %cst_103 {dimension_numbers = #tpu.dot_dimension_numbers<[1], [0], [0], [1], [0, 0, 1, 1], [], []>} : vector<8x16xf32>, vector<16x32xf32>, vector<8x32xf32> -> vector<8x32xf32>
    %c2_104 = arith.constant 2 : index
    %c48_105 = arith.constant 48 : index
    %c0_106 = arith.constant 0 : index
    %191 = vector.load %arg1[%c2_104, %c48_105, %c0_106] : memref<3x113x32xf32, #tpu.memory_space<vmem>>, vector<1x8x32xf32>
    %192 = vector.shape_cast %191 : vector<1x8x32xf32> to vector<8x32xf32>
    %193 = arith.addf %190, %192 : vector<8x32xf32>
    %194 = math.tanh %193 : vector<8x32xf32>
    %195 = arith.mulf %194, %194 : vector<8x32xf32>
    %cst_107 = arith.constant dense<0.000000e+00> : vector<8x32xf32>
    %196 = tpu.matmul %194, %183, %cst_107 {dimension_numbers = #tpu.dot_dimension_numbers<[1], [0], [0], [1], [0, 0, 1, 1], [], []>} : vector<8x32xf32>, vector<32x32xf32>, vector<8x32xf32> -> vector<8x32xf32>
    %197 = arith.addf %190, %196 : vector<8x32xf32>
    %c2_108 = arith.constant 2 : index
    %c56_109 = arith.constant 56 : index
    %c0_110 = arith.constant 0 : index
    %198 = vector.load %arg1[%c2_108, %c56_109, %c0_110] : memref<3x113x32xf32, #tpu.memory_space<vmem>>, vector<1x8x32xf32>
    %199 = vector.shape_cast %198 : vector<1x8x32xf32> to vector<8x32xf32>
    %200 = arith.addf %197, %199 : vector<8x32xf32>
    %201 = math.tanh %200 : vector<8x32xf32>
    %202 = arith.addf %194, %201 : vector<8x32xf32>
    %203 = arith.mulf %201, %201 : vector<8x32xf32>
    %204 = arith.addf %195, %203 : vector<8x32xf32>
    %cst_111 = arith.constant dense<0.000000e+00> : vector<8x32xf32>
    %205 = tpu.matmul %201, %183, %cst_111 {dimension_numbers = #tpu.dot_dimension_numbers<[1], [0], [0], [1], [0, 0, 1, 1], [], []>} : vector<8x32xf32>, vector<32x32xf32>, vector<8x32xf32> -> vector<8x32xf32>
    %206 = arith.addf %197, %205 : vector<8x32xf32>
    %c2_112 = arith.constant 2 : index
    %c64_113 = arith.constant 64 : index
    %c0_114 = arith.constant 0 : index
    %207 = vector.load %arg1[%c2_112, %c64_113, %c0_114] : memref<3x113x32xf32, #tpu.memory_space<vmem>>, vector<1x8x32xf32>
    %208 = vector.shape_cast %207 : vector<1x8x32xf32> to vector<8x32xf32>
    %209 = arith.addf %206, %208 : vector<8x32xf32>
    %210 = math.tanh %209 : vector<8x32xf32>
    %211 = arith.addf %202, %210 : vector<8x32xf32>
    %212 = arith.mulf %210, %210 : vector<8x32xf32>
    %213 = arith.addf %204, %212 : vector<8x32xf32>
    %cst_115 = arith.constant dense<0.000000e+00> : vector<8x32xf32>
    %214 = tpu.matmul %210, %183, %cst_115 {dimension_numbers = #tpu.dot_dimension_numbers<[1], [0], [0], [1], [0, 0, 1, 1], [], []>} : vector<8x32xf32>, vector<32x32xf32>, vector<8x32xf32> -> vector<8x32xf32>
    %215 = arith.addf %206, %214 : vector<8x32xf32>
    %c2_116 = arith.constant 2 : index
    %c72_117 = arith.constant 72 : index
    %c0_118 = arith.constant 0 : index
    %216 = vector.load %arg1[%c2_116, %c72_117, %c0_118] : memref<3x113x32xf32, #tpu.memory_space<vmem>>, vector<1x8x32xf32>
    %217 = vector.shape_cast %216 : vector<1x8x32xf32> to vector<8x32xf32>
    %218 = arith.addf %215, %217 : vector<8x32xf32>
    %219 = math.tanh %218 : vector<8x32xf32>
    %220 = arith.addf %211, %219 : vector<8x32xf32>
    %221 = arith.mulf %219, %219 : vector<8x32xf32>
    %222 = arith.addf %213, %221 : vector<8x32xf32>
    %cst_119 = arith.constant dense<0.000000e+00> : vector<8x32xf32>
    %223 = tpu.matmul %219, %183, %cst_119 {dimension_numbers = #tpu.dot_dimension_numbers<[1], [0], [0], [1], [0, 0, 1, 1], [], []>} : vector<8x32xf32>, vector<32x32xf32>, vector<8x32xf32> -> vector<8x32xf32>
    %224 = arith.addf %215, %223 : vector<8x32xf32>
    %c2_120 = arith.constant 2 : index
    %c80_121 = arith.constant 80 : index
    %c0_122 = arith.constant 0 : index
    %225 = vector.load %arg1[%c2_120, %c80_121, %c0_122] : memref<3x113x32xf32, #tpu.memory_space<vmem>>, vector<1x8x32xf32>
    %226 = vector.shape_cast %225 : vector<1x8x32xf32> to vector<8x32xf32>
    %227 = arith.addf %224, %226 : vector<8x32xf32>
    %228 = math.tanh %227 : vector<8x32xf32>
    %229 = arith.addf %220, %228 : vector<8x32xf32>
    %230 = arith.mulf %228, %228 : vector<8x32xf32>
    %231 = arith.addf %222, %230 : vector<8x32xf32>
    %cst_123 = arith.constant dense<0.000000e+00> : vector<8x32xf32>
    %232 = tpu.matmul %228, %183, %cst_123 {dimension_numbers = #tpu.dot_dimension_numbers<[1], [0], [0], [1], [0, 0, 1, 1], [], []>} : vector<8x32xf32>, vector<32x32xf32>, vector<8x32xf32> -> vector<8x32xf32>
    %233 = arith.addf %224, %232 : vector<8x32xf32>
    %c2_124 = arith.constant 2 : index
    %c88_125 = arith.constant 88 : index
    %c0_126 = arith.constant 0 : index
    %234 = vector.load %arg1[%c2_124, %c88_125, %c0_126] : memref<3x113x32xf32, #tpu.memory_space<vmem>>, vector<1x8x32xf32>
    %235 = vector.shape_cast %234 : vector<1x8x32xf32> to vector<8x32xf32>
    %236 = arith.addf %233, %235 : vector<8x32xf32>
    %237 = math.tanh %236 : vector<8x32xf32>
    %238 = arith.addf %229, %237 : vector<8x32xf32>
    %239 = arith.mulf %237, %237 : vector<8x32xf32>
    %240 = arith.addf %231, %239 : vector<8x32xf32>
    %cst_127 = arith.constant dense<0.000000e+00> : vector<8x32xf32>
    %241 = tpu.matmul %237, %183, %cst_127 {dimension_numbers = #tpu.dot_dimension_numbers<[1], [0], [0], [1], [0, 0, 1, 1], [], []>} : vector<8x32xf32>, vector<32x32xf32>, vector<8x32xf32> -> vector<8x32xf32>
    %242 = arith.addf %233, %241 : vector<8x32xf32>
    %c2_128 = arith.constant 2 : index
    %c96_129 = arith.constant 96 : index
    %c0_130 = arith.constant 0 : index
    %243 = vector.load %arg1[%c2_128, %c96_129, %c0_130] : memref<3x113x32xf32, #tpu.memory_space<vmem>>, vector<1x8x32xf32>
    %244 = vector.shape_cast %243 : vector<1x8x32xf32> to vector<8x32xf32>
    %245 = arith.addf %242, %244 : vector<8x32xf32>
    %246 = math.tanh %245 : vector<8x32xf32>
    %247 = arith.addf %238, %246 : vector<8x32xf32>
    %248 = arith.mulf %246, %246 : vector<8x32xf32>
    %249 = arith.addf %240, %248 : vector<8x32xf32>
    %cst_131 = arith.constant dense<0.000000e+00> : vector<8x32xf32>
    %250 = tpu.matmul %246, %183, %cst_131 {dimension_numbers = #tpu.dot_dimension_numbers<[1], [0], [0], [1], [0, 0, 1, 1], [], []>} : vector<8x32xf32>, vector<32x32xf32>, vector<8x32xf32> -> vector<8x32xf32>
    %251 = arith.addf %242, %250 : vector<8x32xf32>
    %c2_132 = arith.constant 2 : index
    %c104_133 = arith.constant 104 : index
    %c0_134 = arith.constant 0 : index
    %252 = vector.load %arg1[%c2_132, %c104_133, %c0_134] : memref<3x113x32xf32, #tpu.memory_space<vmem>>, vector<1x8x32xf32>
    %253 = vector.shape_cast %252 : vector<1x8x32xf32> to vector<8x32xf32>
    %254 = arith.addf %251, %253 : vector<8x32xf32>
    %255 = math.tanh %254 : vector<8x32xf32>
    %256 = arith.addf %247, %255 : vector<8x32xf32>
    %257 = arith.mulf %255, %255 : vector<8x32xf32>
    %258 = arith.addf %249, %257 : vector<8x32xf32>
    %cst_135 = arith.constant dense<0.000000e+00> : vector<8x16xf32>
    %259 = tpu.matmul %256, %187, %cst_135 {dimension_numbers = #tpu.dot_dimension_numbers<[1], [0], [0], [1], [0, 0, 1, 1], [], []>} : vector<8x32xf32>, vector<32x16xf32>, vector<8x16xf32> -> vector<8x16xf32>
    %260 = arith.addf %172, %259 : vector<8x16xf32>
    %261 = arith.addf %260, %189 : vector<8x16xf32>
    %cst_136 = arith.constant 8.000000e+00 : f32
    %262 = vector.broadcast %cst_136 : f32 to vector<8x32xf32>
    %263 = arith.subf %262, %258 : vector<8x32xf32>
    %264 = vector.broadcast %185 : vector<1x32xf32> to vector<8x32xf32>
    %265 = arith.mulf %263, %264 : vector<8x32xf32>
    %cst_137 = arith.constant dense<0.000000e+00> : vector<8xf32>
    %266 = vector.multi_reduction <add>, %265, %cst_137 [1] : vector<8x32xf32> to vector<8xf32>
    %267 = vector.shape_cast %266 : vector<8xf32> to vector<8x1xf32>
    %268 = arith.subf %179, %267 : vector<8x1xf32>
    %c0_138 = arith.constant 0 : index
    %c0_139 = arith.constant 0 : index
    %269 = vector.load %arg4[%c0_138, %c0_139] : memref<8x16xf32, #tpu.memory_space<vmem>>, vector<8x16xf32>
    tpu.vector_store %arg4[%c0_138, %c0_139], %261 {strides = array<i32>} : memref<8x16xf32, #tpu.memory_space<vmem>>, vector<8x16xf32>,
    %c0_140 = arith.constant 0 : index
    %c0_141 = arith.constant 0 : index
    %270 = vector.load %arg5[%c0_140, %c0_141] : memref<8x1xf32, #tpu.memory_space<vmem>>, vector<8x1xf32>
    tpu.vector_store %arg5[%c0_140, %c0_141], %268 {strides = array<i32>} : memref<8x1xf32, #tpu.memory_space<vmem>>, vector<8x1xf32>,
    return
  }
  func.func @transform_0(%arg0: i32) -> (i32, i32, i32) {
    %c0_i32 = arith.constant 0 : i32
    %c0_i32_0 = arith.constant 0 : i32
    %c0_i32_1 = arith.constant 0 : i32
    %c0_i32_2 = arith.constant 0 : i32
    return %c0_i32, %c0_i32_0, %c0_i32_1 : i32, i32, i32
  }
  func.func @transform_1(%arg0: i32) -> (i32, i32, i32) {
    %c0_i32 = arith.constant 0 : i32
    %c0_i32_0 = arith.constant 0 : i32
    %c0_i32_1 = arith.constant 0 : i32
    %c0_i32_2 = arith.constant 0 : i32
    return %c0_i32, %c0_i32_0, %c0_i32_1 : i32, i32, i32
  }
  func.func @transform_2(%arg0: i32) -> (i32, i32) {
    %c0_i32 = arith.constant 0 : i32
    %c0_i32_0 = arith.constant 0 : i32
    %c0_i32_1 = arith.constant 0 : i32
    return %c0_i32, %c0_i32_0 : i32, i32
  }
  func.func @transform_3(%arg0: i32) -> (i32, i32) {
    %c0_i32 = arith.constant 0 : i32
    %c0_i32_0 = arith.constant 0 : i32
    %c0_i32_1 = arith.constant 0 : i32
    return %c0_i32, %c0_i32_0 : i32, i32
  }
  func.func @transform_4(%arg0: i32) -> (i32, i32) {
    %c0_i32 = arith.constant 0 : i32
    %c0_i32_0 = arith.constant 0 : i32
    %c0_i32_1 = arith.constant 0 : i32
    return %c0_i32, %c0_i32_0 : i32, i32
  }
}

</mosaic_0001>

<bundles_post_ra>
// kernel: neg.1
= control target key start
LH: loop header
LB: loop body
LE: loop exit
PB: predicated region body
PF: predicated region fallthrough
CT: control target
= control target key end

     0   :  { %s24_s0 = inlined_call_operand.vmem [shape: f32[8,1], index: 0, kind: input, shape index: {}]   ;;  %s25_s1 = inlined_call_operand.vmem [shape: f32[8,1], index: 1, kind: output, shape index: {}]  }
   0x1   :  { %v2_v0 = vld [vmem:[%s24_s0] sm:$0xff] }
   0x2   :  { %v5_v1 = vxor.u32 2147483648, %v2_v0 }
   0x4   :  { %7 = vst [vmem:[%s25_s1] sm:$0xff] %v5_v1 }

// kernel: sequential_flow.1
= control target key start
LH: loop header
LB: loop body
LE: loop exit
PB: predicated region body
PF: predicated region fallthrough
CT: control target
= control target key end

     0   :  { %vm29_vm0 = vcmask 130048   ;;  %vm57_vm1 = vcmask 261120   ;;  %vm867_vm2 = vcmask 7168   ;;  %s1252_s0 = inlined_call_operand.vmem [shape: f32[3,113,32], index: 0, kind: input, shape index: {}]   ;;  %s1253_s2 = inlined_call_operand.vmem [shape: f32[8,16], index: 2, kind: input, shape index: {}, may-alias: {2,3}]   ;;  %s1254_s1 = inlined_call_operand.vmem [shape: f32[3,40,16], index: 1, kind: input, shape index: {}]   ;;  %s1255_s4 = inlined_call_operand.vmem [shape: f32[8,1], index: 4, kind: output, shape index: {1}]   ;;  %s1256_s3 = inlined_call_operand.vmem [shape: f32[8,16], index: 3, kind: output, shape index: {0}, may-alias: {2,3}]  }
   0x1   :  { %v18_v0 = vld [vmem:[%s1252_s0 + $0x8] sm:$0xff]  ;;  %v17_v1 = vld [vmem:[%s1252_s0] sm:$0xff]  ;;  %v20_v5 = vld [vmem:[%s1252_s0 + $0x18] sm:$0xff] }
   0x2   :  { %v1029_v2 = vld [vmem:[%s1253_s2] sm:$0xff]  ;;  %47 = vmatpush.msra.mxu0 %v18_v0  ;;  %v22_v3 = vld [vmem:[%s1252_s0 + $0x28] sm:$0xff]  ;;  %v19_v6 = vld [vmem:[%s1252_s0 + $0x10] sm:$0xff] }
   0x3   :  { %73 = vmatpush.msra.mxu1 %v22_v3  ;;  %103 = vmatpush.msra.mxu2 %v22_v3  ;;  %v21_v4 = vld [vmem:[%s1252_s0 + $0x20] sm:$0xff]  ;;  %v53_v7 = vld [vmem:[%s1252_s0 + $0x30] sm:$0xff]  ;;  %v82_v12 = vld [vmem:[%s1252_s0 + $0x38] sm:$0xff] }
   0x4   :  { %48 = vmatpush.msra.mxu0 %v17_v1  ;;  %133 = vmatpush.msra.mxu3 %v22_v3  ;;  %v112_v17 = vld [vmem:[%s1252_s0 + $0x40] sm:$0xff]  ;;  %v142_v29 = vld [vmem:[%s1252_s0 + $0x48] sm:$0xff]  ;;  %v172_v37 = vld [vmem:[%s1252_s0 + $0x50] sm:$0xff] }
   0x5   :  { %877 = vmatmul.msk.f32.vlgmr.msra.gmra.mxu0 %vm29_vm0, %v1029_v2  ;;  %74 = vmatpush.msra.mxu1 %v21_v4  ;;  %v202_v45 = vld [vmem:[%s1252_s0 + $0x58] sm:$0xff]  ;;  %v232_v53 = vld [vmem:[%s1252_s0 + $0x60] sm:$0xff]  ;;  %v26_v61 = vld [vmem:[%s1254_s1 + $0x10] sm:$0xff] }
   0x6   :  { %163 = vmatpush.msrb.mxu0 %v22_v3  ;;  %104 = vmatpush.msra.mxu2 %v21_v4  ;;  %v27_v60 = vld [vmem:[%s1254_s1 + $0x18] sm:$0xff]  ;;  %v25_v62 = vld [vmem:[%s1254_s1 + $0x8] sm:$0xff]  ;;  %v24_v63 = vld [vmem:[%s1254_s1] sm:$0xff] }
   0x7   :  { %134 = vmatpush.msra.mxu3 %v21_v4  ;;  %75 = vmatpush.msra.mxu1 %v20_v5  ;;  %v887_v0 = vld [vmem:[%s1252_s0 + $0x80] sm:$0xff] }
   0x8   :  { %164 = vmatpush.msrb.mxu0 %v21_v4  ;;  %105 = vmatpush.msra.mxu2 %v20_v5 }
   0x9   :  { %135 = vmatpush.msra.mxu3 %v20_v5  ;;  %76 = vmatpush.msra.mxu1 %v19_v6 }
   0xa   :  { %165 = vmatpush.msrb.mxu0 %v20_v5  ;;  %106 = vmatpush.msra.mxu2 %v19_v6 }
   0xb   :  { %136 = vmatpush.msra.mxu3 %v19_v6  ;;  %193 = vmatpush.msrb.mxu1 %v22_v3 }
   0xc   :  { %166 = vmatpush.msrb.mxu0 %v19_v6  ;;  %223 = vmatpush.msrb.mxu2 %v22_v3 }
   0xd   :  { %253 = vmatpush.msrb.mxu3 %v22_v3  ;;  %194 = vmatpush.msrb.mxu1 %v21_v4  ;;  %v262_v3 = vld [vmem:[%s1252_s0 + $0x68] sm:$0xff] }
   0xe   :  { %224 = vmatpush.msrb.mxu2 %v21_v4  ;;  %283 = vmatpush.msra.mxu0 %v27_v60  ;;  %v909_v60 = vld [vmem:[%s1252_s0 + $0xd0] sm:$0xff] }
   0xf   :  { %254 = vmatpush.msrb.mxu3 %v21_v4  ;;  %195 = vmatpush.msrb.mxu1 %v20_v5 }
  0x10   :  { %225 = vmatpush.msrb.mxu2 %v20_v5  ;;  %284 = vmatpush.msra.mxu0 %v26_v61 }
  0x11   :  { %255 = vmatpush.msrb.mxu3 %v20_v5  ;;  %196 = vmatpush.msrb.mxu1 %v19_v6 }
  0x12   :  { %226 = vmatpush.msrb.mxu2 %v19_v6  ;;  %285 = vmatpush.msra.mxu0 %v25_v62 }
  0x13   :  { %256 = vmatpush.msrb.mxu3 %v19_v6 }
  0x14   :  { %286 = vmatpush.msra.mxu0 %v24_v63 }
  0x82   :  { %v50_v8 = vpop.f32.mrf.mxu0 }
  0x83   :  { %v54_v9 = vadd.f32 %v53_v7, %v50_v8 }
  0x85   :  { %947 = vtanh.f32 %v54_v9 }
  0x8b   :  { %v948_v10 = vpop.eup %947 }
  0x8c   :  { %878 = vmatmul.msk.f32.vlgmr.msra.gmra.mxu1 %vm57_vm1, %v948_v10  ;;  %v56_v21 = vmul.f32 %v948_v10, %v948_v10 }
  0x8d   :  { %331 = vmatpush.msra.mxu1 %v887_v0 }
 0x109   :  { %v78_v11 = vpop.f32.mrf.mxu1 }
 0x10a   :  { %v81_v13 = vadd.f32 %v78_v11, %v50_v8 }
 0x10c   :  { %v83_v14 = vadd.f32 %v82_v12, %v81_v13 }
 0x10e   :  { %949 = vtanh.f32 %v83_v14  ;;  %v886_v14 = vld [vmem:[%s1252_s0 + $0x78] sm:$0xff] }
 0x10f   :  { %332 = vmatpush.msra.mxu1 %v886_v14  ;;  %v894_v14 = vld [vmem:[%s1254_s1 + $0x30] sm:$0xff] }
 0x114   :  { %v950_v15 = vpop.eup %949 }
 0x115   :  { %879 = vmatmul.msk.f32.vlgmr.msra.gmra.mxu2 %vm57_vm1, %v950_v15  ;;  %v86_v20 = vmul.f32 %v950_v15, %v950_v15  ;;  %v85_v22 = vadd.f32 %v950_v15, %v948_v10  ;;  %v944_v10 = vld [vmem:[%s1252_s0 + $0x70] ss:$0 sm:$0xff]  ;;  %v28_v15 = vld [vmem:[%s1254_s1 + $0x20] sm:$0xff] }
 0x117   :  { %v87_v25 = vadd.f32 %v86_v20, %v56_v21  ;;  %v890_v20 = vld [vmem:[%s1252_s0 + $0x98] sm:$0xff]  ;;  %v888_v21 = vld [vmem:[%s1252_s0 + $0x88] sm:$0xff] }
 0x198   :  { %v108_v16 = vpop.f32.mrf.mxu2 }
 0x199   :  { %v111_v18 = vadd.f32 %v108_v16, %v81_v13 }
 0x19b   :  { %v113_v19 = vadd.f32 %v112_v17, %v111_v18 }
 0x19d   :  { %951 = vtanh.f32 %v113_v19  ;;  %v891_v19 = vld [vmem:[%s1252_s0 + $0xa0] sm:$0xff] }
 0x19e   :  { %356 = vmatpush.msra.mxu2 %v891_v19 }
 0x1a0   :  { %357 = vmatpush.msra.mxu2 %v890_v20 }
 0x1a3   :  { %v952_v23 = vpop.eup %951 }
 0x1a4   :  { %v115_v24 = vadd.f32 %v952_v23, %v85_v22  ;;  %880 = vmatmul.msk.f32.vlgmr.msra.gmra.mxu3 %vm57_vm1, %v952_v23  ;;  %v116_v26 = vmul.f32 %v952_v23, %v952_v23  ;;  %v899_v22 = vld [vmem:[%s1252_s0 + $0xa8] sm:$0xff] }
 0x1a5   :  { %386 = vmatpush.msra.mxu3 %v891_v19 }
 0x1a6   :  { %v117_v27 = vadd.f32 %v116_v26, %v87_v25 }
 0x1a7   :  { %387 = vmatpush.msra.mxu3 %v890_v20 }
 0x227   :  { %v138_v28 = vpop.f32.mrf.mxu3 }
 0x228   :  { %v141_v30 = vadd.f32 %v138_v28, %v111_v18 }
 0x22a   :  { %v143_v31 = vadd.f32 %v142_v29, %v141_v30 }
 0x22c   :  { %953 = vtanh.f32 %v143_v31 }
 0x232   :  { %v954_v32 = vpop.eup %953 }
 0x233   :  { %881 = vmatmul.msk.f32.vlgmr.msrb.gmra.mxu0 %vm57_vm1, %v954_v32  ;;  %v145_v33 = vadd.f32 %v954_v32, %v115_v24  ;;  %v146_v34 = vmul.f32 %v954_v32, %v954_v32  ;;  %v903_v32 = vld [vmem:[%s1252_s0 + $0xb8] sm:$0xff] }
 0x234   :  { %416 = vmatpush.msrb.mxu0 %v891_v19 }
 0x235   :  { %v147_v35 = vadd.f32 %v146_v34, %v117_v27  ;;  %v901_v27 = vld [vmem:[%s1252_s0 + $0xb0] sm:$0xff] }
 0x236   :  { %417 = vmatpush.msrb.mxu0 %v890_v20 }
 0x2b0   :  { %v168_v36 = vpop.f32.mrf.mxu0 }
 0x2b1   :  { %v171_v38 = vadd.f32 %v168_v36, %v141_v30 }
 0x2b3   :  { %v173_v39 = vadd.f32 %v172_v37, %v171_v38 }
 0x2b5   :  { %955 = vtanh.f32 %v173_v39 }
 0x2bb   :  { %v956_v40 = vpop.eup %955 }
 0x2bc   :  { %882 = vmatmul.msk.f32.vlgmr.msrb.gmra.mxu1 %vm57_vm1, %v956_v40  ;;  %v175_v41 = vadd.f32 %v956_v40, %v145_v33  ;;  %v176_v42 = vmul.f32 %v956_v40, %v956_v40 }
 0x2bd   :  { %446 = vmatpush.msrb.mxu1 %v891_v19 }
 0x2be   :  { %v177_v43 = vadd.f32 %v176_v42, %v147_v35 }
 0x2bf   :  { %447 = vmatpush.msrb.mxu1 %v890_v20 }
 0x339   :  { %v198_v44 = vpop.f32.mrf.mxu1 }
 0x33a   :  { %v201_v46 = vadd.f32 %v198_v44, %v171_v38  ;;  %v905_v44 = vld [vmem:[%s1252_s0 + $0xc0] sm:$0xff] }
 0x33c   :  { %v203_v47 = vadd.f32 %v202_v45, %v201_v46 }
 0x33e   :  { %957 = vtanh.f32 %v203_v47 }
 0x344   :  { %v958_v48 = vpop.eup %957 }
 0x345   :  { %883 = vmatmul.msk.f32.vlgmr.msrb.gmra.mxu2 %vm57_vm1, %v958_v48  ;;  %v205_v49 = vadd.f32 %v958_v48, %v175_v41  ;;  %v206_v50 = vmul.f32 %v958_v48, %v958_v48 }
 0x347   :  { %v207_v51 = vadd.f32 %v206_v50, %v177_v43 }
 0x3c8   :  { %v228_v52 = vpop.f32.mrf.mxu2 }
 0x3c9   :  { %v231_v54 = vadd.f32 %v228_v52, %v201_v46  ;;  %v907_v52 = vld [vmem:[%s1252_s0 + $0xc8] sm:$0xff] }
 0x3cb   :  { %v233_v55 = vadd.f32 %v232_v53, %v231_v54 }
 0x3cd   :  { %959 = vtanh.f32 %v233_v55 }
 0x3d3   :  { %v960_v56 = vpop.eup %959 }
 0x3d4   :  { %884 = vmatmul.msk.f32.vlgmr.msrb.gmra.mxu3 %vm57_vm1, %v960_v56  ;;  %v235_v57 = vadd.f32 %v960_v56, %v205_v49  ;;  %v236_v58 = vmul.f32 %v960_v56, %v960_v56 }
 0x3d6   :  { %v237_v59 = vadd.f32 %v236_v58, %v207_v51 }
 0x457   :  { %v258_v1 = vpop.f32.mrf.mxu3 }
 0x458   :  { %v261_v4 = vadd.f32 %v258_v1, %v231_v54 }
 0x45a   :  { %v263_v5 = vadd.f32 %v262_v3, %v261_v4 }
 0x45c   :  { %961 = vtanh.f32 %v263_v5  ;;  %v911_v5 = vld [vmem:[%s1252_s0 + $0xd8] sm:$0xff] }
 0x462   :  { %v962_v6 = vpop.eup %961 }
 0x463   :  { %v265_v7 = vadd.f32 %v962_v6, %v235_v57  ;;  %v266_v8 = vmul.f32 %v962_v6, %v962_v6 }
 0x465   :  { %885 = vmatmul.msk.f32.vlgmr.msra.gmra.mxu0 %vm57_vm1, %v265_v7  ;;  %v267_v9 = vadd.f32 %v266_v8, %v237_v59 }
 0x467   :  { %v293_v11 = vsub.f32 8.0, %v267_v9 }
 0x469   :  { %v295_v12 = vmul.f32 %v944_v10, %v293_v11 }
 0x46b   :  { %v296_v13 = vsel %vm57_vm1, %v295_v12, 0.0  ;;  %v896_v12 = vld [vmem:[%s1254_s1 + $0x40] sm:$0xff] }
 0x46c   :  { %297 = vadd.xlane.f32.xlu0 %v296_v13  ;;  %v895_v13 = vld [vmem:[%s1254_s1 + $0x38] sm:$0xff] }
 0x4e2   :  { %v288_v16 = vpop.f32.mrf.mxu0 }
 0x4e3   :  { %v291_v17 = vadd.f32 %v288_v16, %v1029_v2  ;;  %v889_v2 = vld [vmem:[%s1252_s0 + $0x90] sm:$0xff]  ;;  %v916_v16 = vld [vmem:[%s1252_s0 + $0xf8] sm:$0xff] }
 0x4e4   :  { %358 = vmatpush.msra.mxu2 %v889_v2  ;;  %388 = vmatpush.msra.mxu3 %v889_v2 }
 0x4e5   :  { %v1103_v18 = vadd.f32 %v291_v17, %v28_v15  ;;  %418 = vmatpush.msrb.mxu0 %v889_v2  ;;  %448 = vmatpush.msrb.mxu1 %v889_v2  ;;  %v893_v15 = vld [vmem:[%s1254_s1 + $0x28] sm:$0xff] }
 0x4e6   :  { %359 = vmatpush.msra.mxu2 %v888_v21  ;;  %389 = vmatpush.msra.mxu3 %v888_v21 }
 0x4e7   :  { %898 = vmatmul.msk.f32.vlgmr.msra.gmra.mxu1 %vm29_vm0, %v1103_v18  ;;  %419 = vmatpush.msrb.mxu0 %v888_v21 }
 0x4e8   :  { %449 = vmatpush.msrb.mxu1 %v888_v21  ;;  %476 = vmatpush.msrb.mxu2 %v891_v19 }
 0x4e9   :  { %506 = vmatpush.msrb.mxu3 %v891_v19  ;;  %536 = vmatpush.msra.mxu0 %v891_v19  ;;  %v913_v19 = vld [vmem:[%s1252_s0 + $0xe0] sm:$0xff] }
 0x4ea   :  { %477 = vmatpush.msrb.mxu2 %v890_v20  ;;  %566 = vmatpush.msra.mxu1 %v896_v12  ;;  %v938_v12 = vld [vmem:[%s1252_s0 + $0x148] sm:$0xff] }
 0x4eb   :  { %507 = vmatpush.msrb.mxu3 %v890_v20  ;;  %537 = vmatpush.msra.mxu0 %v890_v20 }
 0x4ec   :  { %478 = vmatpush.msrb.mxu2 %v889_v2  ;;  %567 = vmatpush.msra.mxu1 %v895_v13 }
 0x4ed   :  { %508 = vmatpush.msrb.mxu3 %v889_v2  ;;  %538 = vmatpush.msra.mxu0 %v889_v2 }
 0x4ee   :  { %479 = vmatpush.msrb.mxu2 %v888_v21  ;;  %568 = vmatpush.msra.mxu1 %v894_v14 }
 0x4ef   :  { %509 = vmatpush.msrb.mxu3 %v888_v21  ;;  %539 = vmatpush.msra.mxu0 %v888_v21 }
 0x4f0   :  { %569 = vmatpush.msra.mxu1 %v893_v15 }
 0x564   :  { %v334_v23 = vpop.f32.mrf.mxu1 }
 0x565   :  { %v338_v24 = vadd.f32 %v899_v22, %v334_v23 }
 0x567   :  { %963 = vtanh.f32 %v338_v24 }
 0x56d   :  { %v964_v25 = vpop.eup %963 }
 0x56e   :  { %900 = vmatmul.msk.f32.vlgmr.msra.gmra.mxu2 %vm57_vm1, %v964_v25  ;;  %v340_v36 = vmul.f32 %v964_v25, %v964_v25 }
 0x56f   :  { %614 = vmatpush.msra.mxu2 %v916_v16 }
 0x5f1   :  { %v361_v26 = vpop.f32.mrf.mxu2 }
 0x5f2   :  { %v364_v28 = vadd.f32 %v361_v26, %v334_v23 }
 0x5f4   :  { %v366_v29 = vadd.f32 %v901_v27, %v364_v28 }
 0x5f6   :  { %965 = vtanh.f32 %v366_v29  ;;  %v915_v29 = vld [vmem:[%s1252_s0 + $0xf0] sm:$0xff] }
 0x5f7   :  { %615 = vmatpush.msra.mxu2 %v915_v29  ;;  %v923_v29 = vld [vmem:[%s1254_s1 + $0x58] sm:$0xff] }
 0x5fc   :  { %v966_v30 = vpop.eup %965 }
 0x5fd   :  { %902 = vmatmul.msk.f32.vlgmr.msra.gmra.mxu3 %vm57_vm1, %v966_v30  ;;  %v369_v35 = vmul.f32 %v966_v30, %v966_v30  ;;  %v368_v37 = vadd.f32 %v966_v30, %v964_v25  ;;  %v945_v25 = vld [vmem:[%s1252_s0 + $0xe8] ss:$0 sm:$0xff] }
 0x5fe   :  { %v897_v30 = vld [vmem:[%s1254_s1 + $0x48] sm:$0xff] }
 0x5ff   :  { %v370_v40 = vadd.f32 %v369_v35, %v340_v36  ;;  %v919_v35 = vld [vmem:[%s1252_s0 + $0x110] sm:$0xff]  ;;  %v917_v36 = vld [vmem:[%s1252_s0 + $0x100] sm:$0xff] }
 0x680   :  { %v391_v31 = vpop.f32.mrf.mxu3 }
 0x681   :  { %v394_v33 = vadd.f32 %v391_v31, %v364_v28 }
 0x683   :  { %v396_v34 = vadd.f32 %v903_v32, %v394_v33 }
 0x685   :  { %967 = vtanh.f32 %v396_v34  ;;  %v920_v34 = vld [vmem:[%s1252_s0 + $0x118] sm:$0xff] }
 0x686   :  { %639 = vmatpush.msra.mxu3 %v920_v34 }
 0x688   :  { %640 = vmatpush.msra.mxu3 %v919_v35 }
 0x68b   :  { %v968_v38 = vpop.eup %967 }
 0x68c   :  { %v398_v39 = vadd.f32 %v968_v38, %v368_v37  ;;  %904 = vmatmul.msk.f32.vlgmr.msrb.gmra.mxu0 %vm57_vm1, %v968_v38  ;;  %v399_v41 = vmul.f32 %v968_v38, %v968_v38  ;;  %v928_v37 = vld [vmem:[%s1252_s0 + $0x120] sm:$0xff] }
 0x68d   :  { %669 = vmatpush.msrb.mxu0 %v920_v34 }
 0x68e   :  { %v400_v42 = vadd.f32 %v399_v41, %v370_v40 }
 0x68f   :  { %670 = vmatpush.msrb.mxu0 %v919_v35 }
 0x709   :  { %v421_v43 = vpop.f32.mrf.mxu0 }
 0x70a   :  { %v424_v45 = vadd.f32 %v421_v43, %v394_v33 }
 0x70c   :  { %v426_v46 = vadd.f32 %v905_v44, %v424_v45 }
 0x70e   :  { %969 = vtanh.f32 %v426_v46 }
 0x714   :  { %v970_v47 = vpop.eup %969 }
 0x715   :  { %906 = vmatmul.msk.f32.vlgmr.msrb.gmra.mxu1 %vm57_vm1, %v970_v47  ;;  %v428_v48 = vadd.f32 %v970_v47, %v398_v39  ;;  %v429_v49 = vmul.f32 %v970_v47, %v970_v47  ;;  %v932_v47 = vld [vmem:[%s1252_s0 + $0x130] sm:$0xff] }
 0x716   :  { %699 = vmatpush.msrb.mxu1 %v920_v34 }
 0x717   :  { %v430_v50 = vadd.f32 %v429_v49, %v400_v42  ;;  %v930_v42 = vld [vmem:[%s1252_s0 + $0x128] sm:$0xff] }
 0x718   :  { %700 = vmatpush.msrb.mxu1 %v919_v35 }
 0x792   :  { %v451_v51 = vpop.f32.mrf.mxu1 }
 0x793   :  { %v454_v53 = vadd.f32 %v451_v51, %v424_v45 }
 0x795   :  { %v456_v54 = vadd.f32 %v907_v52, %v454_v53 }
 0x797   :  { %971 = vtanh.f32 %v456_v54 }
 0x79d   :  { %v972_v55 = vpop.eup %971 }
 0x79e   :  { %908 = vmatmul.msk.f32.vlgmr.msrb.gmra.mxu2 %vm57_vm1, %v972_v55  ;;  %v458_v56 = vadd.f32 %v972_v55, %v428_v48  ;;  %v459_v57 = vmul.f32 %v972_v55, %v972_v55 }
 0x79f   :  { %729 = vmatpush.msrb.mxu2 %v920_v34 }
 0x7a0   :  { %v460_v58 = vadd.f32 %v459_v57, %v430_v50 }
 0x7a1   :  { %730 = vmatpush.msrb.mxu2 %v919_v35 }
 0x821   :  { %v481_v59 = vpop.f32.mrf.mxu2 }
 0x822   :  { %v484_v61 = vadd.f32 %v481_v59, %v454_v53  ;;  %v934_v59 = vld [vmem:[%s1252_s0 + $0x138] sm:$0xff] }
 0x824   :  { %v486_v62 = vadd.f32 %v909_v60, %v484_v61 }
 0x826   :  { %973 = vtanh.f32 %v486_v62 }
 0x82c   :  { %v974_v63 = vpop.eup %973 }
 0x82d   :  { %910 = vmatmul.msk.f32.vlgmr.msrb.gmra.mxu3 %vm57_vm1, %v974_v63  ;;  %v488_v0 = vadd.f32 %v974_v63, %v458_v56  ;;  %v489_v1 = vmul.f32 %v974_v63, %v974_v63 }
 0x82f   :  { %v490_v3 = vadd.f32 %v489_v1, %v460_v58 }
 0x8b0   :  { %v511_v4 = vpop.f32.mrf.mxu3 }
 0x8b1   :  { %v514_v6 = vadd.f32 %v511_v4, %v484_v61  ;;  %v936_v4 = vld [vmem:[%s1252_s0 + $0x140] sm:$0xff] }
 0x8b3   :  { %v516_v7 = vadd.f32 %v911_v5, %v514_v6 }
 0x8b5   :  { %975 = vtanh.f32 %v516_v7 }
 0x8bb   :  { %v976_v8 = vpop.eup %975 }
 0x8bc   :  { %912 = vmatmul.msk.f32.vlgmr.msra.gmra.mxu0 %vm57_vm1, %v976_v8  ;;  %v518_v9 = vadd.f32 %v976_v8, %v488_v0  ;;  %v519_v10 = vmul.f32 %v976_v8, %v976_v8 }
 0x8be   :  { %v520_v11 = vadd.f32 %v519_v10, %v490_v3 }
 0x939   :  { %v541_v17 = vpop.f32.mrf.mxu0 }
 0x93a   :  { %v544_v20 = vadd.f32 %v541_v17, %v514_v6 }
 0x93c   :  { %v546_v2 = vadd.f32 %v913_v19, %v544_v20 }
 0x93e   :  { %977 = vtanh.f32 %v546_v2  ;;  %v940_v2 = vld [vmem:[%s1252_s0 + $0x150] sm:$0xff] }
 0x944   :  { %v978_v21 = vpop.eup %977 }
 0x945   :  { %v548_v22 = vadd.f32 %v978_v21, %v518_v9  ;;  %v549_v23 = vmul.f32 %v978_v21, %v978_v21 }
 0x947   :  { %914 = vmatmul.msk.f32.vlgmr.msra.gmra.mxu1 %vm57_vm1, %v548_v22  ;;  %v550_v24 = vadd.f32 %v549_v23, %v520_v11 }
 0x949   :  { %v576_v26 = vsub.f32 8.0, %v550_v24 }
 0x94b   :  { %v578_v27 = vmul.f32 %v945_v25, %v576_v26 }
 0x94d   :  { %v579_v28 = vsel %vm57_vm1, %v578_v27, 0.0  ;;  %v925_v27 = vld [vmem:[%s1254_s1 + $0x68] sm:$0xff] }
 0x94e   :  { %580 = vadd.xlane.f32.xlu0 %v579_v28  ;;  %v924_v28 = vld [vmem:[%s1254_s1 + $0x60] sm:$0xff] }
 0x9c4   :  { %v571_v31 = vpop.f32.mrf.mxu1 }
 0x9c5   :  { %v574_v32 = vadd.f32 %v571_v31, %v1103_v18  ;;  %v918_v18 = vld [vmem:[%s1252_s0 + $0x108] sm:$0xff] }
 0x9c6   :  { %641 = vmatpush.msra.mxu3 %v918_v18  ;;  %671 = vmatpush.msrb.mxu0 %v918_v18 }
 0x9c7   :  { %v1177_v33 = vadd.f32 %v897_v30, %v574_v32  ;;  %701 = vmatpush.msrb.mxu1 %v918_v18  ;;  %731 = vmatpush.msrb.mxu2 %v918_v18  ;;  %v922_v30 = vld [vmem:[%s1254_s1 + $0x50] sm:$0xff]  ;;  %v942_v32 = vld [vmem:[%s1252_s0 + $0x158] sm:$0xff] }
 0x9c8   :  { %642 = vmatpush.msra.mxu3 %v917_v36  ;;  %672 = vmatpush.msrb.mxu0 %v917_v36 }
 0x9c9   :  { %927 = vmatmul.msk.f32.vlgmr.msra.gmra.mxu2 %vm29_vm0, %v1177_v33  ;;  %702 = vmatpush.msrb.mxu1 %v917_v36 }
 0x9ca   :  { %732 = vmatpush.msrb.mxu2 %v917_v36  ;;  %759 = vmatpush.msrb.mxu3 %v920_v34 }
 0x9cb   :  { %789 = vmatpush.msra.mxu0 %v920_v34  ;;  %819 = vmatpush.msra.mxu1 %v920_v34 }
 0x9cc   :  { %760 = vmatpush.msrb.mxu3 %v919_v35  ;;  %849 = vmatpush.msra.mxu2 %v925_v27 }
 0x9cd   :  { %790 = vmatpush.msra.mxu0 %v919_v35  ;;  %820 = vmatpush.msra.mxu1 %v919_v35 }
 0x9ce   :  { %761 = vmatpush.msrb.mxu3 %v918_v18  ;;  %850 = vmatpush.msra.mxu2 %v924_v28 }
 0x9cf   :  { %791 = vmatpush.msra.mxu0 %v918_v18  ;;  %821 = vmatpush.msra.mxu1 %v918_v18 }
 0x9d0   :  { %762 = vmatpush.msrb.mxu3 %v917_v36  ;;  %851 = vmatpush.msra.mxu2 %v923_v29 }
 0x9d1   :  { %792 = vmatpush.msra.mxu0 %v917_v36  ;;  %822 = vmatpush.msra.mxu1 %v917_v36 }
 0x9d2   :  { %852 = vmatpush.msra.mxu2 %v922_v30 }
 0xa4c   :  { %v617_v38 = vpop.f32.mrf.mxu2 }
 0xa4d   :  { %v621_v39 = vadd.f32 %v928_v37, %v617_v38 }
 0xa4f   :  { %979 = vtanh.f32 %v621_v39  ;;  %v946_v39 = vld [vmem:[%s1252_s0 + $0x160] ss:$0 sm:$0xff] }
 0xa55   :  { %v980_v40 = vpop.eup %979 }
 0xa56   :  { %929 = vmatmul.msk.f32.vlgmr.msra.gmra.mxu3 %vm57_vm1, %v980_v40  ;;  %v623_v51 = vmul.f32 %v980_v40, %v980_v40 }
 0xad9   :  { %v644_v41 = vpop.f32.mrf.mxu3 }
 0xada   :  { %v647_v43 = vadd.f32 %v644_v41, %v617_v38 }
 0xadc   :  { %v649_v44 = vadd.f32 %v930_v42, %v647_v43 }
 0xade   :  { %981 = vtanh.f32 %v649_v44 }
 0xae4   :  { %v982_v45 = vpop.eup %981 }
 0xae5   :  { %931 = vmatmul.msk.f32.vlgmr.msrb.gmra.mxu0 %vm57_vm1, %v982_v45  ;;  %v652_v50 = vmul.f32 %v982_v45, %v982_v45  ;;  %v651_v52 = vadd.f32 %v982_v45, %v980_v40 }
 0xae7   :  { %v653_v55 = vadd.f32 %v652_v50, %v623_v51 }
 0xb62   :  { %v674_v46 = vpop.f32.mrf.mxu0 }
 0xb63   :  { %v677_v48 = vadd.f32 %v674_v46, %v647_v43  ;;  %v298_v43 = vpop.xlane.xlu0 %297 }
 0xb64   :  { %v299_v45 = vsub.f32 0.0, %v298_v43 }
 0xb65   :  { %v679_v49 = vadd.f32 %v932_v47, %v677_v48 }
 0xb67   :  { %983 = vtanh.f32 %v679_v49  ;;  %v926_v49 = vld [vmem:[%s1254_s1 + $0x70] sm:$0xff] }
 0xb6b   :  { %v581_v44 = vpop.xlane.xlu0 %580 }
 0xb6c   :  { %v582_v46 = vsub.f32 %v299_v45, %v581_v44 }
 0xb6d   :  { %v984_v53 = vpop.eup %983 }
 0xb6e   :  { %v681_v54 = vadd.f32 %v984_v53, %v651_v52  ;;  %933 = vmatmul.msk.f32.vlgmr.msrb.gmra.mxu1 %vm57_vm1, %v984_v53  ;;  %v682_v56 = vmul.f32 %v984_v53, %v984_v53 }
 0xb70   :  { %v683_v57 = vadd.f32 %v682_v56, %v653_v55 }
 0xbeb   :  { %v704_v58 = vpop.f32.mrf.mxu1 }
 0xbec   :  { %v707_v60 = vadd.f32 %v704_v58, %v677_v48 }
 0xbee   :  { %v709_v61 = vadd.f32 %v934_v59, %v707_v60 }
 0xbf0   :  { %985 = vtanh.f32 %v709_v61 }
 0xbf6   :  { %v986_v62 = vpop.eup %985 }
 0xbf7   :  { %935 = vmatmul.msk.f32.vlgmr.msrb.gmra.mxu2 %vm57_vm1, %v986_v62  ;;  %v711_v63 = vadd.f32 %v986_v62, %v681_v54  ;;  %v712_v0 = vmul.f32 %v986_v62, %v986_v62 }
 0xbf9   :  { %v713_v1 = vadd.f32 %v712_v0, %v683_v57 }
 0xc7a   :  { %v734_v3 = vpop.f32.mrf.mxu2 }
 0xc7b   :  { %v737_v5 = vadd.f32 %v734_v3, %v707_v60 }
 0xc7d   :  { %v739_v6 = vadd.f32 %v936_v4, %v737_v5 }
 0xc7f   :  { %987 = vtanh.f32 %v739_v6 }
 0xc85   :  { %v988_v7 = vpop.eup %987 }
 0xc86   :  { %937 = vmatmul.msk.f32.vlgmr.msrb.gmra.mxu3 %vm57_vm1, %v988_v7  ;;  %v741_v8 = vadd.f32 %v988_v7, %v711_v63  ;;  %v742_v9 = vmul.f32 %v988_v7, %v988_v7 }
 0xc88   :  { %v743_v10 = vadd.f32 %v742_v9, %v713_v1 }
 0xd09   :  { %v764_v11 = vpop.f32.mrf.mxu3 }
 0xd0a   :  { %v767_v13 = vadd.f32 %v764_v11, %v737_v5 }
 0xd0c   :  { %v769_v14 = vadd.f32 %v938_v12, %v767_v13 }
 0xd0e   :  { %989 = vtanh.f32 %v769_v14 }
 0xd14   :  { %v990_v15 = vpop.eup %989 }
 0xd15   :  { %939 = vmatmul.msk.f32.vlgmr.msra.gmra.mxu0 %vm57_vm1, %v990_v15  ;;  %v771_v16 = vadd.f32 %v990_v15, %v741_v8  ;;  %v772_v17 = vmul.f32 %v990_v15, %v990_v15 }
 0xd17   :  { %v773_v19 = vadd.f32 %v772_v17, %v743_v10 }
 0xd92   :  { %v794_v20 = vpop.f32.mrf.mxu0 }
 0xd93   :  { %v797_v21 = vadd.f32 %v794_v20, %v767_v13 }
 0xd95   :  { %v799_v22 = vadd.f32 %v940_v2, %v797_v21 }
 0xd97   :  { %991 = vtanh.f32 %v799_v22 }
 0xd9d   :  { %v992_v23 = vpop.eup %991 }
 0xd9e   :  { %941 = vmatmul.msk.f32.vlgmr.msra.gmra.mxu1 %vm57_vm1, %v992_v23  ;;  %v801_v24 = vadd.f32 %v992_v23, %v771_v16  ;;  %v802_v25 = vmul.f32 %v992_v23, %v992_v23 }
 0xda0   :  { %v803_v26 = vadd.f32 %v802_v25, %v773_v19 }
 0xe1b   :  { %v824_v31 = vpop.f32.mrf.mxu1 }
 0xe1c   :  { %v827_v34 = vadd.f32 %v824_v31, %v797_v21 }
 0xe1e   :  { %v829_v35 = vadd.f32 %v942_v32, %v827_v34 }
 0xe20   :  { %993 = vtanh.f32 %v829_v35 }
 0xe26   :  { %v994_v18 = vpop.eup %993 }
 0xe27   :  { %v831_v36 = vadd.f32 %v994_v18, %v801_v24  ;;  %v832_v37 = vmul.f32 %v994_v18, %v994_v18 }
 0xe29   :  { %943 = vmatmul.msk.f32.vlgmr.msra.gmra.mxu2 %vm57_vm1, %v831_v36  ;;  %v833_v38 = vadd.f32 %v832_v37, %v803_v26 }
 0xe2b   :  { %v859_v40 = vsub.f32 8.0, %v833_v38 }
 0xe2d   :  { %v861_v41 = vmul.f32 %v946_v39, %v859_v40 }
 0xe2f   :  { %v862_v42 = vsel %vm57_vm1, %v861_v41, 0.0 }
 0xe30   :  { %863 = vadd.xlane.f32.xlu1 %v862_v42 }
 0xea3   :  { %v864_v47 = vpop.xlane.xlu1 %863 }
 0xea4   :  { %v865_v48 = vsub.f32 %v582_v46, %v864_v47 }
 0xea6   :  { %868 = vst.msk [vmem:[%s1255_s4] sm:$0xff] %vm867_vm2, %v865_v48 }
 0xeac   :  { %v854_v50 = vpop.f32.mrf.mxu2 }
 0xead   :  { %v857_v51 = vadd.f32 %v854_v50, %v1177_v33 }
 0xeaf   :  { %v858_v52 = vadd.f32 %v926_v49, %v857_v51 }
 0xeb1   :  { %866 = vst.msk [vmem:[%s1256_s3] sm:$0xff] %vm29_vm0, %v858_v52 }

</bundles_post_ra>
